<compile_context>
chip_gen: v7x
topology: tpu7x:2x2x1
jax: 0.10.0
libtpu: 0.0.40
codegen_flags: <defaults>
</compile_context>

<pallas_src>
import functools

import jax
import jax.numpy as jnp
from jax.experimental import pallas as pl
from jax.experimental.pallas import tpu as pltpu


def _normalizer_kernel(x_ref, mean_ref, std_ref, o_ref, *, eps, inverse):
    # mean/std are a single (1, Dp) row; clamp (+ reciprocal) is done on that
    # row only and broadcast over the (row_tile, Dp) x tile.
    std = jnp.maximum(std_ref[...], eps)          # torch.clamp(std, min=eps)
    x = x_ref[...].astype(jnp.float32)
    m = mean_ref[...]
    if inverse:
        out = x * std + m
    else:
        inv = pl.reciprocal(std, approx=False)    # exact 1/x on the row
        out = (x - m) * inv
    o_ref[...] = out.astype(o_ref.dtype)


def gaussian_normalizer_forward(x, mean, std, *, eps=1e-08, inverse=False,
                                row_tile=None):
    """Pallas forward of GaussianNormalizer.

    x:    (B, D) array (float32 expected)
    mean: (D,)   float32
    std:  (D,)   float32
    """
    B, D = x.shape
    out_dtype = x.dtype

    mean_f = mean.astype(jnp.float32).reshape(-1)
    std_f = std.astype(jnp.float32).reshape(-1)

    # ---- lane-dense packing / padding of the feature dim ------------------
    if D % 128 == 0:
        k = 1
        Dp = D
        x2 = x
        mean_row = mean_f.reshape(1, Dp)
        std_row = std_f.reshape(1, Dp)
    elif D < 128 and 128 % D == 0:
        # Pack k consecutive batch rows into one 128-lane row.
        k = 128 // D
        Dp = 128
        rows0 = pl.cdiv(B, k)
        pad_b = rows0 * k - B
        x2 = jnp.pad(x, ((0, pad_b), (0, 0))) if pad_b else x
        x2 = x2.reshape(rows0, Dp)
        mean_row = jnp.tile(mean_f, (k,)).reshape(1, Dp)
        std_row = jnp.tile(std_f, (k,)).reshape(1, Dp)
    else:
        # Pad lane dim to a multiple of 128 (std padded with 1.0, mean with 0).
        k = 1
        Dp = ((D + 127) // 128) * 128
        pad_d = Dp - D
        x2 = jnp.pad(x, ((0, 0), (0, pad_d)))
        mean_row = jnp.pad(mean_f, (0, pad_d)).reshape(1, Dp)
        std_row = jnp.pad(std_f, (0, pad_d), constant_values=1.0).reshape(1, Dp)

    rows = x2.shape[0]

    # ---- row tile: big enough to amortize per-step overhead, small enough
    # that the double-buffered pipeline fits scoped VMEM on v5e/v6e/v7x.
    if row_tile is None:
        target_tile_bytes = 2 * 1024 * 1024       # ~2 MiB/tile -> ~8 MiB piped
        row_tile = target_tile_bytes // (Dp * 4)
        row_tile = max(8, min(2048, row_tile))
    row_tile = max(8, (row_tile // 8) * 8)
    row_tile = min(row_tile, ((rows + 7) // 8) * 8)   # whole (padded) array cap

    rows_pad = pl.cdiv(rows, row_tile) * row_tile
    if rows_pad != rows:
        x2 = jnp.pad(x2, ((0, rows_pad - rows), (0, 0)))

    grid = (rows_pad // row_tile,)
    kernel = functools.partial(_normalizer_kernel, eps=eps, inverse=inverse)

    out = pl.pallas_call(
        kernel,
        out_shape=jax.ShapeDtypeStruct((rows_pad, Dp), out_dtype),
        grid_spec=pltpu.PrefetchScalarGridSpec(
            num_scalar_prefetch=0,
            grid=grid,
            in_specs=[
                pl.BlockSpec((row_tile, Dp), lambda i: (i, 0)),   # x tile
                pl.BlockSpec((1, Dp), lambda i: (0, 0)),          # mean row
                pl.BlockSpec((1, Dp), lambda i: (0, 0)),          # std row
            ],
            out_specs=pl.BlockSpec((row_tile, Dp), lambda i: (i, 0)),
        ),
        compiler_params=pltpu.CompilerParams(
            dimension_semantics=("parallel",)),
        cost_estimate=pl.CostEstimate(
            flops=2 * rows_pad * Dp,
            transcendentals=0,
            bytes_accessed=2 * rows_pad * Dp * 4 + 2 * Dp * 4),
    )(x2, mean_row, std_row)

    # ---- unpack / unpad back to (B, D) -------------------------------------
    if k > 1:
        out = out.reshape(rows_pad * k, D)[:B, :]
    else:
        out = out[:B, :D]
    return out


if __name__ == "__main__":
    eps = 1e-08
    key = jax.random.PRNGKey(0)
    kx, km, ks = jax.random.split(key, 3)

    def ref_forward(x, mean, std, inverse=False):
        c = jnp.maximum(std, eps)
        return x * c + mean if inverse else (x - mean) / c

    # TODO(synk): update()/state_dict()/load_state_dict() are host-side running
    # statistics bookkeeping, not part of the forward pass; not ported.

    # Test cases: (B, D) covering the lane-packing path (D=32 -> 128 lanes),
    # the lane-padding path (D=200 -> 256 lanes), and non-multiple batch sizes.
    cases = [(16, 32), (24, 200)]
    for B, D in cases:
        kx, k1, k2, k3 = jax.random.split(kx, 4)
        x = jax.random.normal(k1, (B, D), dtype=jnp.float32)

        # Module __init__: mean=zeros, std=ones.  Also a non-trivial pair (as
        # if .update() had run) to exercise clamp + broadcast.
        mean_init = jnp.zeros((D,), dtype=jnp.float32)
        std_init = jnp.ones((D,), dtype=jnp.float32)
        mean_upd = jax.random.normal(k2, (D,), dtype=jnp.float32)
        std_upd = jnp.abs(jax.random.normal(k3, (D,), dtype=jnp.float32))
        std_upd = std_upd.at[0].set(0.0)          # hit clamp(min=eps)

        for mean, std in [(mean_init, std_init), (mean_upd, std_upd)]:
            for inverse in (False, True):
                y = gaussian_normalizer_forward(
                    x, mean, std, eps=eps, inverse=inverse)
                y = jax.block_until_ready(y)
                y_ref = ref_forward(x, mean, std, inverse=inverse)
                assert y.shape == x.shape and y.dtype == x.dtype
                assert jnp.allclose(y, y_ref, rtol=1e-5, atol=1e-6), \
                    f"mismatch vs reference (B={B}, D={D}, inverse={inverse})"

    print("KERNEL_OK")
</pallas_src>

<mosaic_0001>
module attributes {stable_mosaic.version = 11 : i64} {
  func.func @_normalizer_kernel(%arg0: i32, %arg1: memref<8x128xf32, #tpu.memory_space<vmem>>, %arg2: memref<1x128xf32, #tpu.memory_space<vmem>>, %arg3: memref<1x128xf32, #tpu.memory_space<vmem>>, %arg4: memref<8x128xf32, #tpu.memory_space<vmem>>) attributes {dimension_semantics = [#tpu.dimension_semantics<parallel>], iteration_bounds = array<i64: 1>, scalar_prefetch = 0 : i64, scratch_operands = 0 : i64, tpu.core_type = #tpu.core_type<tc>, window_params = [{transform_indices = @transform_0, window_bounds = array<i64: 8, 128>}, {pipeline_mode = #tpu.pipeline_mode<synchronous>, transform_indices = @transform_1, window_bounds = array<i64: 1, 128>}, {pipeline_mode = #tpu.pipeline_mode<synchronous>, transform_indices = @transform_2, window_bounds = array<i64: 1, 128>}, {transform_indices = @transform_3, window_bounds = array<i64: 8, 128>}]} {
    %c0 = arith.constant 0 : index
    %c0_0 = arith.constant 0 : index
    %0 = vector.load %arg3[%c0, %c0_0] : memref<1x128xf32, #tpu.memory_space<vmem>>, vector<1x128xf32>
    %cst = arith.constant 9.99999993E-9 : f32
    %1 = vector.broadcast %cst : f32 to vector<1x128xf32>
    %2 = arith.maximumf %0, %1 : vector<1x128xf32>
    %c0_1 = arith.constant 0 : index
    %c0_2 = arith.constant 0 : index
    %3 = vector.load %arg1[%c0_1, %c0_2] : memref<8x128xf32, #tpu.memory_space<vmem>>, vector<8x128xf32>
    %c0_3 = arith.constant 0 : index
    %c0_4 = arith.constant 0 : index
    %4 = vector.load %arg2[%c0_3, %c0_4] : memref<1x128xf32, #tpu.memory_space<vmem>>, vector<1x128xf32>
    %5 = tpu.reciprocal %2 : vector<1x128xf32> -> vector<1x128xf32>
    %6 = vector.broadcast %4 : vector<1x128xf32> to vector<8x128xf32>
    %7 = arith.subf %3, %6 : vector<8x128xf32>
    %8 = vector.broadcast %5 : vector<1x128xf32> to vector<8x128xf32>
    %9 = arith.mulf %7, %8 : vector<8x128xf32>
    %c0_5 = arith.constant 0 : index
    %c0_6 = arith.constant 0 : index
    %10 = vector.load %arg4[%c0_5, %c0_6] : memref<8x128xf32, #tpu.memory_space<vmem>>, vector<8x128xf32>
    tpu.vector_store %arg4[%c0_5, %c0_6], %9 {strides = array<i32>} : memref<8x128xf32, #tpu.memory_space<vmem>>, vector<8x128xf32>,
    return
  }
  func.func @transform_0(%arg0: i32) -> (i32, i32) {
    %c0_i32 = arith.constant 0 : i32
    %c0_i32_0 = arith.constant 0 : i32
    return %arg0, %c0_i32 : i32, i32
  }
  func.func @transform_1(%arg0: i32) -> (i32, i32) {
    %c0_i32 = arith.constant 0 : i32
    %c0_i32_0 = arith.constant 0 : i32
    %c0_i32_1 = arith.constant 0 : i32
    return %c0_i32, %c0_i32_0 : i32, i32
  }
  func.func @transform_2(%arg0: i32) -> (i32, i32) {
    %c0_i32 = arith.constant 0 : i32
    %c0_i32_0 = arith.constant 0 : i32
    %c0_i32_1 = arith.constant 0 : i32
    return %c0_i32, %c0_i32_0 : i32, i32
  }
  func.func @transform_3(%arg0: i32) -> (i32, i32) {
    %c0_i32 = arith.constant 0 : i32
    %c0_i32_0 = arith.constant 0 : i32
    return %arg0, %c0_i32 : i32, i32
  }
}

</mosaic_0001>

<bundles_post_ra>
// kernel: tpu_custom_call.1
= control target key start
LH: loop header
LB: loop body
LE: loop exit
PB: predicated region body
PF: predicated region fallthrough
CT: control target
= control target key end

     0   :  { %8 = vsyncpa [#allocation3], 0  ;;  %s167_s0 = inlined_call_operand.hbm [shape: f32[8,128], index: 0, kind: input, shape index: {}]   ;;  %s168_s1 = inlined_call_operand.vmem [shape: f32[1,128], index: 1, kind: input, shape index: {}]   ;;  %s169_s2 = inlined_call_operand.vmem [shape: f32[1,128], index: 2, kind: input, shape index: {}]   ;;  %s170_s3 = inlined_call_operand.hbm [shape: f32[8,128], index: 3, kind: output, shape index: {}]  }
   0x1   :  { %9 = vsyncpa [#allocation4], 0  ;;  %s115_s12 = smov [#allocation2]   ;;  %s67_s16 = scalar_lea.hbm %s167_s0, 128 }
   0x2   :  { %s16_s13 = sshll.u32 %s115_s12, 4  ;;  %p68_p0 = scmp.ne.s32.totalorder %s167_s0, %s67_s16  ;;  %s17_s13 = int_to_ptr.vmem [resolvable:$true] %s16_s13 }
   0x3   :  { %p71_p1 = scmp.lt.u32.totalorder %s67_s16, %s167_s0 }
   0x5   :  { %p73_p2 = pnand %p71_p1, %p68_p0 }
   0x7   :  { %76 = shalt.err (!%p73_p2)
}
   0x8   :  { %s77_s21 = scalar_lea.vmem %s17_s13, 128  ;;  %p82_p4 = scmp.lt.s32.totalorder %s17_s13, %s17_s13 }
   0x9   :  { %p78_p3 = scmp.ne.s32.totalorder %s17_s13, %s77_s21  ;;  %p83_p5 = scmp.lt.s32.totalorder %s77_s21, %s77_s21 }
   0xb   :  { %p84_p6 = por %p83_p5, %p82_p4 }
   0xd   :  { %p85_p7 = pnand %p84_p6, %p78_p3 }
   0xf   :  { %88 = shalt.err (!%p85_p7)
}
  0x10   :  { %19 = dma.hbm_to_vmem [thread:$0]  %s167_s0, 128, %s17_s13, [#allocation3]  }
  0x11   :  { %111 = dma.done.wait [#allocation3], 128  }
  0x12   :  { %112 = vsyncadd [#allocation3], 4294967168  ;;  %v27_v0 = vld [vmem:[%s169_s2] sm:$0x1]  ;;  %v40_v2 = vlaneseq  ;;  %s116_s28 = smov [#allocation5]  }
  0x13   :  { %v28_v1 = vmax.f32 %v27_v0, 1e-08  ;;  %v29_v4 = vld [vmem:[#allocation2] sm:$0xff]  ;;  %s53_s0 = sshll.u32 %s116_s28, 4  ;;  %s54_s0 = int_to_ptr.vmem [resolvable:$true] %s53_s0 }
  0x14   :  { %v41_v3 = vshrl.u32 %v40_v2, 7  ;;  %v62_v5 = vld [vmem:[%s168_s1] ss:$0 sm:$0xff]  ;;  %s89_s29 = scalar_lea.vmem %s54_s0, 128  ;;  %p94_p9 = scmp.lt.s32.totalorder %s54_s0, %s54_s0 }
  0x15   :  { %65 = vrcp.f32 %v28_v1  ;;  %v38_v7 = vsub.f32 %v29_v4, %v62_v5  ;;  %p90_p8 = scmp.ne.s32.totalorder %s54_s0, %s89_s29  ;;  %p95_p10 = scmp.lt.s32.totalorder %s89_s29, %s89_s29 }
  0x16   :  { %v42_v6 = vsub.s32 0, %v41_v3 }
  0x17   :  { %p96_p11 = por %p95_p10, %p94_p9 }
  0x19   :  { %p97_p12 = pnand %p96_p11, %p90_p8 }
  0x1f   :  { %v66_v8 = vpop.eup %65 }
  0x20   :  { %v43_v9 = vrot.slane %v66_v8, %v42_v6 }
  0x22   :  { %v45_v10 = vmul.f32 %v43_v9, %v38_v7 }
  0x24   :  { %46 = vst [vmem:[#allocation5] sm:$0xff] %v45_v10 }
  0x25   :  { %100 = shalt.err (!%p97_p12)
}
  0x26   :  { %s101_s1 = scalar_lea.hbm %s170_s3, 128 }
  0x27   :  { %p102_p13 = scmp.ne.s32.totalorder %s170_s3, %s101_s1  ;;  %p105_p0 = scmp.lt.u32.totalorder %s101_s1, %s170_s3 }
  0x29   :  { %p107_p1 = pnand %p105_p0, %p102_p13 }
  0x2b   :  { %110 = shalt.err (!%p107_p1)
}
  0x2c   :  { %56 = dma.vmem_to_hbm [thread:$0]  %s54_s0, 128, %s170_s3, [#allocation4]  }
  0x2d   :  { %113 = dma.done.wait [#allocation4], 128  }
  0x2e   :  { %114 = vsyncadd [#allocation4], 4294967168 }
  0x2f   :  { %60 = vsyncpa [#allocation3], 1 }
  0x30   :  { %61 = vsyncpa [#allocation4], 1 }

</bundles_post_ra>
